<compile_context>
chip_gen: v7x
topology: tpu7x:2x2x1
jax: 0.10.0
libtpu: 0.0.40
codegen_flags: <defaults>
</compile_context>

<pallas_src>
import functools

import jax
import jax.numpy as jnp
from jax import lax
from jax.experimental import pallas as pl
from jax.experimental.pallas import tpu as pltpu

EPS = 1e-5
LANE = 128
ROW_ALIGN = 16  # multiple of both the f32 (8) and bf16 (16) sublane tile


def _round_up(x, m):
    return (x + m - 1) // m * m


def _vmem_capacity_bytes():
    try:
        return int(pltpu.get_tpu_info().vmem_capacity_bytes)
    except Exception:
        return 64 << 20  # conservative default (v7x per-core VMEM)


def _pick_tile_n(n, per_row_bytes, budget_bytes=16 << 20, cap=2048):
    """Largest ROW_ALIGN-multiple row tile whose double-buffered tiles fit the budget."""
    tile = min(budget_bytes // max(per_row_bytes, 1), cap, _round_up(n, ROW_ALIGN))
    return max(ROW_ALIGN, (int(tile) // ROW_ALIGN) * ROW_ALIGN)


# ---------------------------------------------------------------------------
# Fused kernel: grid = (2 passes, num_tiles).  h lives in a VMEM scratch.
#   pass 0: layer1 + ReLU, store h to VMEM, accumulate BN sum / ssq (scratch).
#   pass 1: fused BN affine (scale/shift cached on first tile) + layer2.
# ---------------------------------------------------------------------------
def _fused_kernel(x_ref, w1_ref, b1_ref, gamma_ref, beta_ref, w2_ref, b2_ref,
                  o_ref, h_vmem, sum_vmem, ssq_vmem, scale_vmem, shift_vmem,
                  *, n_valid, tile_n, num_tiles, mask_last, compute_dtype):
    p = pl.program_id(0)                       # 0 = layer1 + stats, 1 = BN + layer2
    i = pl.program_id(1)                       # row-tile index
    row0 = pl.multiple_of(i * tile_n, tile_n)

    @pl.when(p == 0)
    def _pass0():
        @pl.when(i == 0)
        def _init():
            sum_vmem[...] = jnp.zeros_like(sum_vmem)
            ssq_vmem[...] = jnp.zeros_like(ssq_vmem)

        x = x_ref[...].astype(compute_dtype)                              # [tile_n, In]
        h = jnp.dot(x, w1_ref[...], preferred_element_type=jnp.float32)   # [tile_n, Hpad]
        h = jnp.maximum(h + b1_ref[...], 0.0)
        h_vmem[pl.ds(row0, tile_n), :] = h

        def _accumulate(hm):
            sum_vmem[...] += jnp.sum(hm, axis=0, keepdims=True)
            ssq_vmem[...] += jnp.sum(hm * hm, axis=0, keepdims=True)

        if mask_last:
            # Only the final tile can contain batch-padding rows.
            @pl.when(i == num_tiles - 1)
            def _():
                row = row0 + lax.broadcasted_iota(jnp.int32, h.shape, 0)
                _accumulate(jnp.where(row < n_valid, h, 0.0))

            @pl.when(i != num_tiles - 1)
            def _():
                _accumulate(h)
        else:
            _accumulate(h)

    @pl.when(p == 1)
    def _pass1():
        @pl.when(i == 0)
        def _bn_coefficients():        # computed once per call, cached in scratch
            inv_n = 1.0 / n_valid
            mean = sum_vmem[...] * inv_n
            var = jnp.maximum(ssq_vmem[...] * inv_n - mean * mean, 0.0)
            scale = lax.rsqrt(var + EPS) * gamma_ref[...]
            scale_vmem[...] = scale
            shift_vmem[...] = beta_ref[...] - mean * scale

        h = h_vmem[pl.ds(row0, tile_n), :] * scale_vmem[...] + shift_vmem[...]
        # TODO(synk): Dropout(p=0.1) kept as identity (eval semantics); a
        # training-mode dropout would use pltpu.prng_seed + prng_random_bits here.
        out = jnp.dot(h.astype(compute_dtype), w2_ref[...],
                      preferred_element_type=jnp.float32) + b2_ref[...]
        o_ref[...] = out.astype(o_ref.dtype)


def _forward_fused(x, kparams, *, out_dim, tile_n, vmem_cap):
    n, in_dim = x.shape
    w1, b1 = kparams["w1"], kparams["b1"]
    gamma, beta = kparams["gamma"], kparams["beta"]
    w2, b2 = kparams["w2"], kparams["b2"]
    hpad, out_pad = w2.shape
    compute_dtype = w1.dtype
    cd_size = jnp.dtype(compute_dtype).itemsize

    n_pad = _round_up(n, tile_n)
    if n_pad != n:
        x = jnp.pad(x, ((0, n_pad - n), (0, 0)))
    num_tiles = n_pad // tile_n

    # True VMEM requirement + headroom, clamped below physical capacity.
    tile_io_bytes = 2 * 4 * tile_n * (in_dim + out_pad)            # double-buffered x / out
    weight_bytes = 2 * (cd_size * (in_dim * hpad + hpad * out_pad)
                        + 4 * (3 * hpad + out_pad))
    scratch_bytes = 4 * n_pad * hpad + 4 * 4 * hpad
    vmem_limit = int(min(vmem_cap - (4 << 20),
                         tile_io_bytes + weight_bytes + scratch_bytes + (8 << 20)))

    cost = pl.CostEstimate(
        flops=2 * n_pad * hpad * (in_dim + out_pad) + 8 * n_pad * hpad,
        transcendentals=hpad,
        bytes_accessed=4 * n_pad * (in_dim + out_pad)
        + cd_size * hpad * (in_dim + out_pad) + 4 * (4 * hpad + out_pad),
    )

    out_padded = pl.pallas_call(
        functools.partial(_fused_kernel, n_valid=n, tile_n=tile_n,
                          num_tiles=num_tiles, mask_last=(n_pad != n),
                          compute_dtype=compute_dtype),
        out_shape=jax.ShapeDtypeStruct((n_pad, out_pad), jnp.float32),
        grid=(2, num_tiles),
        in_specs=[
            # x is only needed in pass 0; pass 1 pins it to block 0 (one tiny DMA).
            pl.BlockSpec((tile_n, in_dim), lambda p, i: (i * (1 - p), 0)),
            pl.BlockSpec((in_dim, hpad), lambda p, i: (0, 0)),
            pl.BlockSpec((1, hpad), lambda p, i: (0, 0)),
            pl.BlockSpec((1, hpad), lambda p, i: (0, 0)),
            pl.BlockSpec((1, hpad), lambda p, i: (0, 0)),
            pl.BlockSpec((hpad, out_pad), lambda p, i: (0, 0)),
            pl.BlockSpec((1, out_pad), lambda p, i: (0, 0)),
        ],
        # Output only written in pass 1; pass 0 parks on block 0 so no garbage
        # writeback ever happens (block index changes only after a real write).
        out_specs=pl.BlockSpec((tile_n, out_pad), lambda p, i: (i * p, 0)),
        scratch_shapes=[
            pltpu.VMEM((n_pad, hpad), jnp.float32),   # VMEM-resident h intermediate
            pltpu.VMEM((1, hpad), jnp.float32),       # BN sum accumulator
            pltpu.VMEM((1, hpad), jnp.float32),       # BN sum-of-squares accumulator
            pltpu.VMEM((1, hpad), jnp.float32),       # cached BN scale
            pltpu.VMEM((1, hpad), jnp.float32),       # cached BN shift
        ],
        compiler_params=pltpu.CompilerParams(
            # Pass axis is inherently sequential; the tile axis is sequential
            # too because BN sum/ssq accumulate in resident scratch.
            dimension_semantics=("arbitrary", "arbitrary"),
            vmem_limit_bytes=vmem_limit),
        cost_estimate=cost,
    )(x, w1, b1, gamma, beta, w2, b2)

    return out_padded[:n, :out_dim]


# ---------------------------------------------------------------------------
# Fallback two-phase path (h does not fit VMEM): bf16 HBM intermediate.
# TODO(synk): for v7x megacore, phase 1 could emit per-tile partial stats with
# dimension_semantics=("parallel",) and reduce them once before phase 2.
# ---------------------------------------------------------------------------
def _phase1_kernel(x_ref, w1_ref, b1_ref, h_ref, sum_ref, ssq_ref,
                   *, n_valid, tile_n, num_tiles, mask_last, compute_dtype):
    i = pl.program_id(0)

    @pl.when(i == 0)
    def _init():
        sum_ref[...] = jnp.zeros_like(sum_ref)
        ssq_ref[...] = jnp.zeros_like(ssq_ref)

    x = x_ref[...].astype(compute_dtype)                              # [tile_n, In]
    h = jnp.dot(x, w1_ref[...], preferred_element_type=jnp.float32)   # [tile_n, Hpad]
    h = jnp.maximum(h + b1_ref[...], 0.0)
    h_ref[...] = h.astype(h_ref.dtype)          # bf16 store: half the HBM traffic

    def _accumulate(hm):
        sum_ref[...] += jnp.sum(hm, axis=0, keepdims=True)
        ssq_ref[...] += jnp.sum(hm * hm, axis=0, keepdims=True)

    if mask_last:
        @pl.when(i == num_tiles - 1)
        def _():
            row = i * tile_n + lax.broadcasted_iota(jnp.int32, h.shape, 0)
            _accumulate(jnp.where(row < n_valid, h, 0.0))

        @pl.when(i != num_tiles - 1)
        def _():
            _accumulate(h)
    else:
        _accumulate(h)


def _phase2_kernel(h_ref, sum_ref, ssq_ref, gamma_ref, beta_ref, w2_ref, b2_ref,
                   o_ref, *, n_valid, compute_dtype):
    inv_n = 1.0 / n_valid
    mean = sum_ref[...] * inv_n                                # [1, Hpad]
    var = jnp.maximum(ssq_ref[...] * inv_n - mean * mean, 0.0)
    scale = lax.rsqrt(var + EPS) * gamma_ref[...]              # fused BN affine
    shift = beta_ref[...] - mean * scale
    h = h_ref[...].astype(jnp.float32) * scale + shift         # [tile_n, Hpad]
    # TODO(synk): Dropout(p=0.1) identity here as well.
    out = jnp.dot(h.astype(compute_dtype), w2_ref[...],
                  preferred_element_type=jnp.float32) + b2_ref[...]
    o_ref[...] = out.astype(o_ref.dtype)


def _forward_two_phase(x, kparams, *, out_dim, tile_n, vmem_cap):
    n, in_dim = x.shape
    w1, b1 = kparams["w1"], kparams["b1"]
    gamma, beta = kparams["gamma"], kparams["beta"]
    w2, b2 = kparams["w2"], kparams["b2"]
    hpad, out_pad = w2.shape
    compute_dtype = w1.dtype
    cd_size = jnp.dtype(compute_dtype).itemsize
    h_dtype = jnp.bfloat16

    n_pad = _round_up(n, tile_n)
    if n_pad != n:
        x = jnp.pad(x, ((0, n_pad - n), (0, 0)))
    num_tiles = n_pad // tile_n

    tile1_bytes = 2 * tile_n * (4 * in_dim + 2 * hpad)
    tile2_bytes = 2 * tile_n * (2 * hpad + 4 * out_pad)
    weight_bytes = 2 * (cd_size * (in_dim * hpad + hpad * out_pad)
                        + 4 * (5 * hpad + out_pad))
    vmem_limit = int(min(vmem_cap - (4 << 20),
                         max(tile1_bytes, tile2_bytes) + weight_bytes + (8 << 20)))

    cost1 = pl.CostEstimate(
        flops=2 * n_pad * in_dim * hpad + 5 * n_pad * hpad,
        transcendentals=0,
        bytes_accessed=4 * n_pad * in_dim + cd_size * in_dim * hpad
        + 2 * n_pad * hpad + 3 * 4 * hpad,
    )
    h_inter, h_sum, h_ssq = pl.pallas_call(
        functools.partial(_phase1_kernel, n_valid=n, tile_n=tile_n,
                          num_tiles=num_tiles, mask_last=(n_pad != n),
                          compute_dtype=compute_dtype),
        out_shape=(
            jax.ShapeDtypeStruct((n_pad, hpad), h_dtype),
            jax.ShapeDtypeStruct((1, hpad), jnp.float32),
            jax.ShapeDtypeStruct((1, hpad), jnp.float32),
        ),
        grid=(num_tiles,),
        in_specs=[
            pl.BlockSpec((tile_n, in_dim), lambda i: (i, 0)),
            pl.BlockSpec((in_dim, hpad), lambda i: (0, 0)),
            pl.BlockSpec((1, hpad), lambda i: (0, 0)),
        ],
        out_specs=(
            pl.BlockSpec((tile_n, hpad), lambda i: (i, 0)),
            pl.BlockSpec((1, hpad), lambda i: (0, 0)),   # resident accumulator
            pl.BlockSpec((1, hpad), lambda i: (0, 0)),   # resident accumulator
        ),
        compiler_params=pltpu.CompilerParams(
            dimension_semantics=("arbitrary",),
            vmem_limit_bytes=vmem_limit),
        cost_estimate=cost1,
    )(x, w1, b1)

    cost2 = pl.CostEstimate(
        flops=2 * n_pad * hpad * out_pad + 4 * n_pad * hpad,
        transcendentals=hpad * num_tiles,
        bytes_accessed=2 * n_pad * hpad + cd_size * hpad * out_pad
        + 4 * (4 * hpad + out_pad) + 4 * n_pad * out_pad,
    )
    out_padded = pl.pallas_call(
        functools.partial(_phase2_kernel, n_valid=n, compute_dtype=compute_dtype),
        out_shape=jax.ShapeDtypeStruct((n_pad, out_pad), jnp.float32),
        grid=(num_tiles,),
        in_specs=[
            pl.BlockSpec((tile_n, hpad), lambda i: (i, 0)),
            pl.BlockSpec((1, hpad), lambda i: (0, 0)),
            pl.BlockSpec((1, hpad), lambda i: (0, 0)),
            pl.BlockSpec((1, hpad), lambda i: (0, 0)),
            pl.BlockSpec((1, hpad), lambda i: (0, 0)),
            pl.BlockSpec((hpad, out_pad), lambda i: (0, 0)),
            pl.BlockSpec((1, out_pad), lambda i: (0, 0)),
        ],
        out_specs=pl.BlockSpec((tile_n, out_pad), lambda i: (i, 0)),
        compiler_params=pltpu.CompilerParams(
            dimension_semantics=("parallel",),   # independent tiles -> megacore
            vmem_limit_bytes=vmem_limit),
        cost_estimate=cost2,
    )(h_inter, h_sum, h_ssq, gamma, beta, w2, b2)

    return out_padded[:n, :out_dim]


# ---------------------------------------------------------------------------
# Top-level wrapper
# ---------------------------------------------------------------------------
def network_forward(x, kparams, *, out_dim, tile_n=None, force_two_phase=False):
    """x: [N, input_size] float32.  kparams: kernel-ready params (prepare_kernel_params)."""
    n, in_dim = x.shape
    hpad, out_pad = kparams["w2"].shape
    vmem_cap = _vmem_capacity_bytes()

    if tile_n is None:
        per_row = 2 * 4 * (in_dim + 2 * hpad + out_pad)
        tile_n = _pick_tile_n(n, per_row, budget_bytes=16 << 20)
    tile_n = max(ROW_ALIGN, (int(tile_n) // ROW_ALIGN) * ROW_ALIGN)

    # Keep h entirely in VMEM when it fits ~3/8 of physical VMEM
    # (~24 MiB on v7x, ~48 MiB on v5e/v6e); otherwise fall back to the
    # two-phase path with a bf16 HBM intermediate.
    n_pad = _round_up(n, tile_n)
    h_bytes = 4 * n_pad * hpad
    use_fused = (not force_two_phase) and (h_bytes <= (vmem_cap * 3) // 8)

    if use_fused:
        return _forward_fused(x, kparams, out_dim=out_dim, tile_n=tile_n,
                              vmem_cap=vmem_cap)
    return _forward_two_phase(x, kparams, out_dim=out_dim, tile_n=tile_n,
                              vmem_cap=vmem_cap)


# ---------------------------------------------------------------------------
# Parameters
# ---------------------------------------------------------------------------
def init_params(key, input_size, hidden1_size, output_size):
    """PyTorch-default init, stored in torch nn.Linear layout ([out, in])."""
    k1, k2, k3, k4 = jax.random.split(key, 4)
    lim1 = 1.0 / jnp.sqrt(input_size)
    lim2 = 1.0 / jnp.sqrt(hidden1_size)
    return {
        "w1": jax.random.uniform(k1, (hidden1_size, input_size), jnp.float32, -lim1, lim1),
        "b1": jax.random.uniform(k2, (hidden1_size,), jnp.float32, -lim1, lim1),
        "w2": jax.random.uniform(k3, (output_size, hidden1_size), jnp.float32, -lim2, lim2),
        "b2": jax.random.uniform(k4, (output_size,), jnp.float32, -lim2, lim2),
        "gamma": jnp.ones((hidden1_size,), jnp.float32),
        "beta": jnp.zeros((hidden1_size,), jnp.float32),
    }


def prepare_kernel_params(params, compute_dtype=jnp.bfloat16):
    """One-time conversion to kernel layout: transposed, lane-padded, pre-cast.

    Padded hidden/output lanes are zero so they contribute nothing to the BN
    statistics or the final projection.
    """
    h, in_dim = params["w1"].shape
    out = params["w2"].shape[0]
    hpad = _round_up(h, LANE)
    out_pad = _round_up(out, LANE)

    w1 = jnp.zeros((in_dim, hpad), compute_dtype).at[:, :h].set(
        params["w1"].T.astype(compute_dtype))
    w2 = jnp.zeros((hpad, out_pad), compute_dtype).at[:h, :out].set(
        params["w2"].T.astype(compute_dtype))
    b1 = jnp.zeros((1, hpad), jnp.float32).at[0, :h].set(params["b1"])
    gamma = jnp.zeros((1, hpad), jnp.float32).at[0, :h].set(params["gamma"])
    beta = jnp.zeros((1, hpad), jnp.float32).at[0, :h].set(params["beta"])
    b2 = jnp.zeros((1, out_pad), jnp.float32).at[0, :out].set(params["b2"])
    return {"w1": w1, "b1": b1, "gamma": gamma, "beta": beta, "w2": w2, "b2": b2}


# ---------------------------------------------------------------------------
# Pure-JAX reference (mirrors kernel precision: bf16 matmul operands, f32 BN,
# optional bf16 storage rounding of the h intermediate).
# ---------------------------------------------------------------------------
def _reference_forward(x, params, compute_dtype=jnp.bfloat16,
                       h_storage_dtype=jnp.float32):
    cd = compute_dtype
    h = jnp.dot(x.astype(cd), params["w1"].astype(cd).T,
                preferred_element_type=jnp.float32) + params["b1"]
    h = jnp.maximum(h, 0.0)
    n = h.shape[0]
    mean = jnp.sum(h, axis=0, keepdims=True) / n
    var = jnp.maximum(jnp.sum(h * h, axis=0, keepdims=True) / n - mean * mean, 0.0)
    scale = lax.rsqrt(var + EPS) * params["gamma"]
    shift = params["beta"] - mean * scale
    h = h.astype(h_storage_dtype).astype(jnp.float32) * scale + shift
    return jnp.dot(h.astype(cd), params["w2"].astype(cd).T,
                   preferred_element_type=jnp.float32) + params["b2"]


if __name__ == "__main__":
    input_size, hidden1_size, output_size = 16, 32, 4
    batch = 200                      # not a multiple of the tile -> exercises masking

    key = jax.random.PRNGKey(0)
    kx, kp = jax.random.split(key)
    x = jax.random.normal(kx, (batch, input_size), jnp.float32)
    params = init_params(kp, input_size, hidden1_size, output_size)

    compute_dtype = jnp.bfloat16
    kparams = prepare_kernel_params(params, compute_dtype=compute_dtype)

    # Fused single-kernel path (h resident in VMEM) -- the default.
    fwd_fused = jax.jit(functools.partial(network_forward, out_dim=output_size,
                                          tile_n=64))
    out_fused = jax.block_until_ready(fwd_fused(x, kparams))
    ref_f32h = _reference_forward(x, params, compute_dtype=compute_dtype)
    assert out_fused.shape == (batch, output_size)
    assert jnp.allclose(out_fused, ref_f32h, atol=2e-3, rtol=2e-3), \
        "fused path mismatch vs. JAX reference"

    # Two-phase fallback path (bf16 HBM intermediate) -- used for very large batches.
    fwd_2p = jax.jit(functools.partial(network_forward, out_dim=output_size,
                                       tile_n=64, force_two_phase=True))
    out_2p = jax.block_until_ready(fwd_2p(x, kparams))
    ref_bf16h = _reference_forward(x, params, compute_dtype=compute_dtype,
                                   h_storage_dtype=jnp.bfloat16)
    assert out_2p.shape == (batch, output_size)
    assert jnp.allclose(out_2p, ref_bf16h, atol=2e-3, rtol=2e-3), \
        "two-phase path mismatch vs. JAX reference"

    print("KERNEL_OK")
</pallas_src>

<mosaic_0001>
module attributes {stable_mosaic.version = 11 : i64} {
  func.func @_fused_kernel(%arg0: i32, %arg1: i32, %arg2: memref<64x16xf32, #tpu.memory_space<vmem>>, %arg3: memref<16x128xbf16, #tpu.memory_space<vmem>>, %arg4: memref<1x128xf32, #tpu.memory_space<vmem>>, %arg5: memref<1x128xf32, #tpu.memory_space<vmem>>, %arg6: memref<1x128xf32, #tpu.memory_space<vmem>>, %arg7: memref<128x128xbf16, #tpu.memory_space<vmem>>, %arg8: memref<1x128xf32, #tpu.memory_space<vmem>>, %arg9: memref<64x128xf32, #tpu.memory_space<vmem>>, %arg10: memref<256x128xf32, #tpu.memory_space<vmem>>, %arg11: memref<1x128xf32, #tpu.memory_space<vmem>>, %arg12: memref<1x128xf32, #tpu.memory_space<vmem>>, %arg13: memref<1x128xf32, #tpu.memory_space<vmem>>, %arg14: memref<1x128xf32, #tpu.memory_space<vmem>>) attributes {dimension_semantics = [#tpu.dimension_semantics<arbitrary>, #tpu.dimension_semantics<arbitrary>], iteration_bounds = array<i64: 2, 4>, scalar_prefetch = 0 : i64, scratch_operands = 5 : i64, tpu.core_type = #tpu.core_type<tc>, window_params = [{transform_indices = @transform_0, window_bounds = array<i64: 64, 16>}, {pipeline_mode = #tpu.pipeline_mode<synchronous>, transform_indices = @transform_1, window_bounds = array<i64: 16, 128>}, {pipeline_mode = #tpu.pipeline_mode<synchronous>, transform_indices = @transform_2, window_bounds = array<i64: 1, 128>}, {pipeline_mode = #tpu.pipeline_mode<synchronous>, transform_indices = @transform_3, window_bounds = array<i64: 1, 128>}, {pipeline_mode = #tpu.pipeline_mode<synchronous>, transform_indices = @transform_4, window_bounds = array<i64: 1, 128>}, {pipeline_mode = #tpu.pipeline_mode<synchronous>, transform_indices = @transform_5, window_bounds = array<i64: 128, 128>}, {pipeline_mode = #tpu.pipeline_mode<synchronous>, transform_indices = @transform_6, window_bounds = array<i64: 1, 128>}, {transform_indices = @transform_7, window_bounds = array<i64: 64, 128>}]} {
    %c64_i32 = arith.constant 64 : i32
    %0 = arith.muli %arg1, %c64_i32 : i32
    %1 = tpu.assume_multiple %0, 64 : i32
    %c0_i32 = arith.constant 0 : i32
    %2 = arith.cmpi eq, %arg0, %c0_i32 : i32
    %3 = arith.extui %2 : i1 to i32
    %c0_i32_0 = arith.constant 0 : i32
    %4 = arith.cmpi ne, %3, %c0_i32_0 : i32
    scf.if %4 {
      %c0_i32_2 = arith.constant 0 : i32
      %8 = arith.cmpi eq, %arg1, %c0_i32_2 : i32
      %9 = arith.extui %8 : i1 to i32
      %c0_i32_3 = arith.constant 0 : i32
      %10 = arith.cmpi ne, %9, %c0_i32_3 : i32
      scf.if %10 {
        %cst_14 = arith.constant 0.000000e+00 : f32
        %28 = vector.broadcast %cst_14 : f32 to vector<1x128xf32>
        %c0_15 = arith.constant 0 : index
        %c0_16 = arith.constant 0 : index
        %29 = vector.load %arg11[%c0_15, %c0_16] : memref<1x128xf32, #tpu.memory_space<vmem>>, vector<1x128xf32>
        tpu.vector_store %arg11[%c0_15, %c0_16], %28 {strides = array<i32>} : memref<1x128xf32, #tpu.memory_space<vmem>>, vector<1x128xf32>,
        %cst_17 = arith.constant 0.000000e+00 : f32
        %30 = vector.broadcast %cst_17 : f32 to vector<1x128xf32>
        %c0_18 = arith.constant 0 : index
        %c0_19 = arith.constant 0 : index
        %31 = vector.load %arg12[%c0_18, %c0_19] : memref<1x128xf32, #tpu.memory_space<vmem>>, vector<1x128xf32>
        tpu.vector_store %arg12[%c0_18, %c0_19], %30 {strides = array<i32>} : memref<1x128xf32, #tpu.memory_space<vmem>>, vector<1x128xf32>,
      } else {
      }
      %c0 = arith.constant 0 : index
      %c0_4 = arith.constant 0 : index
      %11 = vector.load %arg2[%c0, %c0_4] : memref<64x16xf32, #tpu.memory_space<vmem>>, vector<64x16xf32>
      %12 = arith.truncf %11 : vector<64x16xf32> to vector<64x16xbf16>
      %c0_5 = arith.constant 0 : index
      %c0_6 = arith.constant 0 : index
      %13 = vector.load %arg3[%c0_5, %c0_6] : memref<16x128xbf16, #tpu.memory_space<vmem>>, vector<16x128xbf16>
      %cst = arith.constant dense<0.000000e+00> : vector<64x128xf32>
      %14 = tpu.matmul %12, %13, %cst {dimension_numbers = #tpu.dot_dimension_numbers<[1], [0], [0], [1], [0, 0, 1, 1], [], []>} : vector<64x16xbf16>, vector<16x128xbf16>, vector<64x128xf32> -> vector<64x128xf32>
      %c0_7 = arith.constant 0 : index
      %c0_8 = arith.constant 0 : index
      %15 = vector.load %arg4[%c0_7, %c0_8] : memref<1x128xf32, #tpu.memory_space<vmem>>, vector<1x128xf32>
      %16 = vector.broadcast %15 : vector<1x128xf32> to vector<64x128xf32>
      %17 = arith.addf %14, %16 : vector<64x128xf32>
      %cst_9 = arith.constant 0.000000e+00 : f32
      %18 = vector.broadcast %cst_9 : f32 to vector<64x128xf32>
      %19 = arith.maximumf %17, %18 : vector<64x128xf32>
      %20 = arith.index_cast %1 : i32 to index
      %c0_10 = arith.constant 0 : index
      %21 = vector.load %arg10[%20, %c0_10] : memref<256x128xf32, #tpu.memory_space<vmem>>, vector<64x128xf32>
      tpu.vector_store %arg10[%20, %c0_10], %19 {strides = array<i32>} : memref<256x128xf32, #tpu.memory_space<vmem>>, vector<64x128xf32>,
      %c3_i32 = arith.constant 3 : i32
      %22 = arith.cmpi eq, %arg1, %c3_i32 : i32
      %23 = arith.extui %22 : i1 to i32
      %c0_i32_11 = arith.constant 0 : i32
      %24 = arith.cmpi ne, %23, %c0_i32_11 : i32
      scf.if %24 {
        %28 = tpu.iota {dimensions = array<i32: 0>} : vector<64x128xi32>
        %29 = vector.broadcast %1 : i32 to vector<64x128xi32>
        %30 = arith.addi %29, %28 : vector<64x128xi32>
        %c200_i32 = arith.constant 200 : i32
        %31 = vector.broadcast %c200_i32 : i32 to vector<64x128xi32>
        %32 = arith.cmpi slt, %30, %31 : vector<64x128xi32>
        %cst_14 = arith.constant 0.000000e+00 : f32
        %33 = vector.broadcast %cst_14 : f32 to vector<64x128xf32>
        %34 = arith.select %32, %19, %33 : vector<64x128xi1>, vector<64x128xf32>
        %c0_15 = arith.constant 0 : index
        %c0_16 = arith.constant 0 : index
        %35 = vector.load %arg11[%c0_15, %c0_16] : memref<1x128xf32, #tpu.memory_space<vmem>>, vector<1x128xf32>
        %cst_17 = arith.constant dense<0.000000e+00> : vector<128xf32>
        %36 = vector.multi_reduction <add>, %34, %cst_17 [0] : vector<64x128xf32> to vector<128xf32>
        %37 = vector.shape_cast %36 : vector<128xf32> to vector<1x128xf32>
        %38 = arith.addf %35, %37 : vector<1x128xf32>
        %c0_18 = arith.constant 0 : index
        %c0_19 = arith.constant 0 : index
        %39 = vector.load %arg11[%c0_18, %c0_19] : memref<1x128xf32, #tpu.memory_space<vmem>>, vector<1x128xf32>
        tpu.vector_store %arg11[%c0_18, %c0_19], %38 {strides = array<i32>} : memref<1x128xf32, #tpu.memory_space<vmem>>, vector<1x128xf32>,
        %c0_20 = arith.constant 0 : index
        %c0_21 = arith.constant 0 : index
        %40 = vector.load %arg12[%c0_20, %c0_21] : memref<1x128xf32, #tpu.memory_space<vmem>>, vector<1x128xf32>
        %41 = arith.mulf %34, %34 : vector<64x128xf32>
        %cst_22 = arith.constant dense<0.000000e+00> : vector<128xf32>
        %42 = vector.multi_reduction <add>, %41, %cst_22 [0] : vector<64x128xf32> to vector<128xf32>
        %43 = vector.shape_cast %42 : vector<128xf32> to vector<1x128xf32>
        %44 = arith.addf %40, %43 : vector<1x128xf32>
        %c0_23 = arith.constant 0 : index
        %c0_24 = arith.constant 0 : index
        %45 = vector.load %arg12[%c0_23, %c0_24] : memref<1x128xf32, #tpu.memory_space<vmem>>, vector<1x128xf32>
        tpu.vector_store %arg12[%c0_23, %c0_24], %44 {strides = array<i32>} : memref<1x128xf32, #tpu.memory_space<vmem>>, vector<1x128xf32>,
      } else {
      }
      %c3_i32_12 = arith.constant 3 : i32
      %25 = arith.cmpi ne, %arg1, %c3_i32_12 : i32
      %26 = arith.extui %25 : i1 to i32
      %c0_i32_13 = arith.constant 0 : i32
      %27 = arith.cmpi ne, %26, %c0_i32_13 : i32
      scf.if %27 {
        %c0_14 = arith.constant 0 : index
        %c0_15 = arith.constant 0 : index
        %28 = vector.load %arg11[%c0_14, %c0_15] : memref<1x128xf32, #tpu.memory_space<vmem>>, vector<1x128xf32>
        %cst_16 = arith.constant dense<0.000000e+00> : vector<128xf32>
        %29 = vector.multi_reduction <add>, %19, %cst_16 [0] : vector<64x128xf32> to vector<128xf32>
        %30 = vector.shape_cast %29 : vector<128xf32> to vector<1x128xf32>
        %31 = arith.addf %28, %30 : vector<1x128xf32>
        %c0_17 = arith.constant 0 : index
        %c0_18 = arith.constant 0 : index
        %32 = vector.load %arg11[%c0_17, %c0_18] : memref<1x128xf32, #tpu.memory_space<vmem>>, vector<1x128xf32>
        tpu.vector_store %arg11[%c0_17, %c0_18], %31 {strides = array<i32>} : memref<1x128xf32, #tpu.memory_space<vmem>>, vector<1x128xf32>,
        %c0_19 = arith.constant 0 : index
        %c0_20 = arith.constant 0 : index
        %33 = vector.load %arg12[%c0_19, %c0_20] : memref<1x128xf32, #tpu.memory_space<vmem>>, vector<1x128xf32>
        %34 = arith.mulf %19, %19 : vector<64x128xf32>
        %cst_21 = arith.constant dense<0.000000e+00> : vector<128xf32>
        %35 = vector.multi_reduction <add>, %34, %cst_21 [0] : vector<64x128xf32> to vector<128xf32>
        %36 = vector.shape_cast %35 : vector<128xf32> to vector<1x128xf32>
        %37 = arith.addf %33, %36 : vector<1x128xf32>
        %c0_22 = arith.constant 0 : index
        %c0_23 = arith.constant 0 : index
        %38 = vector.load %arg12[%c0_22, %c0_23] : memref<1x128xf32, #tpu.memory_space<vmem>>, vector<1x128xf32>
        tpu.vector_store %arg12[%c0_22, %c0_23], %37 {strides = array<i32>} : memref<1x128xf32, #tpu.memory_space<vmem>>, vector<1x128xf32>,
      } else {
      }
    } else {
    }
    %c1_i32 = arith.constant 1 : i32
    %5 = arith.cmpi eq, %arg0, %c1_i32 : i32
    %6 = arith.extui %5 : i1 to i32
    %c0_i32_1 = arith.constant 0 : i32
    %7 = arith.cmpi ne, %6, %c0_i32_1 : i32
    scf.if %7 {
      %c0_i32_2 = arith.constant 0 : i32
      %8 = arith.cmpi eq, %arg1, %c0_i32_2 : i32
      %9 = arith.extui %8 : i1 to i32
      %c0_i32_3 = arith.constant 0 : i32
      %10 = arith.cmpi ne, %9, %c0_i32_3 : i32
      scf.if %10 {
        %c0_14 = arith.constant 0 : index
        %c0_15 = arith.constant 0 : index
        %26 = vector.load %arg11[%c0_14, %c0_15] : memref<1x128xf32, #tpu.memory_space<vmem>>, vector<1x128xf32>
        %cst_16 = arith.constant 5.000000e-03 : f32
        %27 = vector.broadcast %cst_16 : f32 to vector<1x128xf32>
        %28 = arith.mulf %26, %27 : vector<1x128xf32>
        %c0_17 = arith.constant 0 : index
        %c0_18 = arith.constant 0 : index
        %29 = vector.load %arg12[%c0_17, %c0_18] : memref<1x128xf32, #tpu.memory_space<vmem>>, vector<1x128xf32>
        %cst_19 = arith.constant 5.000000e-03 : f32
        %30 = vector.broadcast %cst_19 : f32 to vector<1x128xf32>
        %31 = arith.mulf %29, %30 : vector<1x128xf32>
        %32 = arith.mulf %28, %28 : vector<1x128xf32>
        %33 = arith.subf %31, %32 : vector<1x128xf32>
        %cst_20 = arith.constant 0.000000e+00 : f32
        %34 = vector.broadcast %cst_20 : f32 to vector<1x128xf32>
        %35 = arith.maximumf %33, %34 : vector<1x128xf32>
        %cst_21 = arith.constant 9.99999974E-6 : f32
        %36 = vector.broadcast %cst_21 : f32 to vector<1x128xf32>
        %37 = arith.addf %35, %36 : vector<1x128xf32>
        %38 = math.rsqrt %37 : vector<1x128xf32>
        %c0_22 = arith.constant 0 : index
        %c0_23 = arith.constant 0 : index
        %39 = vector.load %arg5[%c0_22, %c0_23] : memref<1x128xf32, #tpu.memory_space<vmem>>, vector<1x128xf32>
        %40 = arith.mulf %38, %39 : vector<1x128xf32>
        %c0_24 = arith.constant 0 : index
        %c0_25 = arith.constant 0 : index
        %41 = vector.load %arg13[%c0_24, %c0_25] : memref<1x128xf32, #tpu.memory_space<vmem>>, vector<1x128xf32>
        tpu.vector_store %arg13[%c0_24, %c0_25], %40 {strides = array<i32>} : memref<1x128xf32, #tpu.memory_space<vmem>>, vector<1x128xf32>,
        %c0_26 = arith.constant 0 : index
        %c0_27 = arith.constant 0 : index
        %42 = vector.load %arg6[%c0_26, %c0_27] : memref<1x128xf32, #tpu.memory_space<vmem>>, vector<1x128xf32>
        %43 = arith.mulf %28, %40 : vector<1x128xf32>
        %44 = arith.subf %42, %43 : vector<1x128xf32>
        %c0_28 = arith.constant 0 : index
        %c0_29 = arith.constant 0 : index
        %45 = vector.load %arg14[%c0_28, %c0_29] : memref<1x128xf32, #tpu.memory_space<vmem>>, vector<1x128xf32>
        tpu.vector_store %arg14[%c0_28, %c0_29], %44 {strides = array<i32>} : memref<1x128xf32, #tpu.memory_space<vmem>>, vector<1x128xf32>,
      } else {
      }
      %11 = arith.index_cast %1 : i32 to index
      %c0 = arith.constant 0 : index
      %12 = vector.load %arg10[%11, %c0] : memref<256x128xf32, #tpu.memory_space<vmem>>, vector<64x128xf32>
      %c0_4 = arith.constant 0 : index
      %c0_5 = arith.constant 0 : index
      %13 = vector.load %arg13[%c0_4, %c0_5] : memref<1x128xf32, #tpu.memory_space<vmem>>, vector<1x128xf32>
      %14 = vector.broadcast %13 : vector<1x128xf32> to vector<64x128xf32>
      %15 = arith.mulf %12, %14 : vector<64x128xf32>
      %c0_6 = arith.constant 0 : index
      %c0_7 = arith.constant 0 : index
      %16 = vector.load %arg14[%c0_6, %c0_7] : memref<1x128xf32, #tpu.memory_space<vmem>>, vector<1x128xf32>
      %17 = vector.broadcast %16 : vector<1x128xf32> to vector<64x128xf32>
      %18 = arith.addf %15, %17 : vector<64x128xf32>
      %19 = arith.truncf %18 : vector<64x128xf32> to vector<64x128xbf16>
      %c0_8 = arith.constant 0 : index
      %c0_9 = arith.constant 0 : index
      %20 = vector.load %arg7[%c0_8, %c0_9] : memref<128x128xbf16, #tpu.memory_space<vmem>>, vector<128x128xbf16>
      %cst = arith.constant dense<0.000000e+00> : vector<64x128xf32>
      %21 = tpu.matmul %19, %20, %cst {dimension_numbers = #tpu.dot_dimension_numbers<[1], [0], [0], [1], [0, 0, 1, 1], [], []>} : vector<64x128xbf16>, vector<128x128xbf16>, vector<64x128xf32> -> vector<64x128xf32>
      %c0_10 = arith.constant 0 : index
      %c0_11 = arith.constant 0 : index
      %22 = vector.load %arg8[%c0_10, %c0_11] : memref<1x128xf32, #tpu.memory_space<vmem>>, vector<1x128xf32>
      %23 = vector.broadcast %22 : vector<1x128xf32> to vector<64x128xf32>
      %24 = arith.addf %21, %23 : vector<64x128xf32>
      %c0_12 = arith.constant 0 : index
      %c0_13 = arith.constant 0 : index
      %25 = vector.load %arg9[%c0_12, %c0_13] : memref<64x128xf32, #tpu.memory_space<vmem>>, vector<64x128xf32>
      tpu.vector_store %arg9[%c0_12, %c0_13], %24 {strides = array<i32>} : memref<64x128xf32, #tpu.memory_space<vmem>>, vector<64x128xf32>,
    } else {
    }
    return
  }
  func.func @transform_0(%arg0: i32, %arg1: i32) -> (i32, i32) {
    %c1_i32 = arith.constant 1 : i32
    %0 = arith.subi %c1_i32, %arg0 : i32
    %1 = arith.muli %arg1, %0 : i32
    %c0_i32 = arith.constant 0 : i32
    %c0_i32_0 = arith.constant 0 : i32
    return %1, %c0_i32 : i32, i32
  }
  func.func @transform_1(%arg0: i32, %arg1: i32) -> (i32, i32) {
    %c0_i32 = arith.constant 0 : i32
    %c0_i32_0 = arith.constant 0 : i32
    %c0_i32_1 = arith.constant 0 : i32
    return %c0_i32, %c0_i32_0 : i32, i32
  }
  func.func @transform_2(%arg0: i32, %arg1: i32) -> (i32, i32) {
    %c0_i32 = arith.constant 0 : i32
    %c0_i32_0 = arith.constant 0 : i32
    %c0_i32_1 = arith.constant 0 : i32
    return %c0_i32, %c0_i32_0 : i32, i32
  }
  func.func @transform_3(%arg0: i32, %arg1: i32) -> (i32, i32) {
    %c0_i32 = arith.constant 0 : i32
    %c0_i32_0 = arith.constant 0 : i32
    %c0_i32_1 = arith.constant 0 : i32
    return %c0_i32, %c0_i32_0 : i32, i32
  }
  func.func @transform_4(%arg0: i32, %arg1: i32) -> (i32, i32) {
    %c0_i32 = arith.constant 0 : i32
    %c0_i32_0 = arith.constant 0 : i32
    %c0_i32_1 = arith.constant 0 : i32
    return %c0_i32, %c0_i32_0 : i32, i32
  }
  func.func @transform_5(%arg0: i32, %arg1: i32) -> (i32, i32) {
    %c0_i32 = arith.constant 0 : i32
    %c0_i32_0 = arith.constant 0 : i32
    %c0_i32_1 = arith.constant 0 : i32
    return %c0_i32, %c0_i32_0 : i32, i32
  }
  func.func @transform_6(%arg0: i32, %arg1: i32) -> (i32, i32) {
    %c0_i32 = arith.constant 0 : i32
    %c0_i32_0 = arith.constant 0 : i32
    %c0_i32_1 = arith.constant 0 : i32
    return %c0_i32, %c0_i32_0 : i32, i32
  }
  func.func @transform_7(%arg0: i32, %arg1: i32) -> (i32, i32) {
    %0 = arith.muli %arg1, %arg0 : i32
    %c0_i32 = arith.constant 0 : i32
    %c0_i32_0 = arith.constant 0 : i32
    return %0, %c0_i32 : i32, i32
  }
}

</mosaic_0001>

<bundles_post_ra>
// kernel: network_forward.1
= control target key start
LH: loop header
LB: loop body
LE: loop exit
PB: predicated region body
PF: predicated region fallthrough
CT: control target
= control target key end

     0   :  { %s1092_s24 = smov 0   ;;  %s1094_s25 = smov 0   ;;  %s1282_s0 = inlined_call_operand.vmem [shape: f32[256,16], index: 0, kind: input, shape index: {}]   ;;  %s1283_s1 = inlined_call_operand.vmem [shape: bf16[16,128], index: 1, kind: input, shape index: {}]   ;;  %s1284_s2 = inlined_call_operand.vmem [shape: f32[1,128], index: 2, kind: input, shape index: {}]   ;;  %s1285_s3 = inlined_call_operand.vmem [shape: f32[1,128], index: 3, kind: input, shape index: {}]   ;;  %s1286_s4 = inlined_call_operand.vmem [shape: f32[1,128], index: 4, kind: input, shape index: {}]   ;;  %s1287_s5 = inlined_call_operand.vmem [shape: bf16[128,128], index: 5, kind: input, shape index: {}]   ;;  %s1288_s6 = inlined_call_operand.vmem [shape: f32[1,128], index: 6, kind: input, shape index: {}]   ;;  %s1289_s7 = inlined_call_operand.vmem [shape: f32[256,128], index: 7, kind: output, shape index: {}]  }
   0x1   :  { %s1096_s26 = smov 0   ;;  %s1098_s27 = smov 0  }
   0x2   :  { %s1100_s28 = smov 0  }
   0x3 LB: > { %s26_s29 = sadd.s32 1, %s1041_s26  ;;  %s29_s30 = sadd.s32 1, %s1045_s27  ;;  %s1049_s28 = sphi %s1100_s28, %s17_s28   ;;  %s1045_s27 = sphi %s1098_s27, %s1293_s27   ;;  %s1041_s26 = sphi %s1096_s26, %s1292_s26   ;;  %s1037_s25 = sphi %s1094_s25, %s1291_s25   ;;  %s1033_s24 = sphi %s1092_s24, %s1290_s24  }
   0x4   : > { %p27_p0 = scmp.ge.s32.totalorder %s26_s29, 4  ;;  %p859_p1 = scmp.ge.s32.totalorder %s1049_s28, 1 }
   0x5   : > { %p260_p2 = scmp.lt.s32.totalorder %s1049_s28, 9 }
   0x6   : > { %s1295_s29 = smov (%p27_p0, %s26_s29), 0  ;;  %s1297_s30 = smov (!%p27_p0, %s29_s30), %s1045_s27 }
   0x7   : > { %p261_p3 = pnand %p859_p1, %p260_p2  ;;  %p31_p4 = scmp.ge.s32.totalorder %s1297_s30, 2 }
   0x8   : > { %s295_s8 = ssub.s32 (!%p261_p3), 1, %s1037_s25  ;;  %s305_s9 = smul.u32 (!%p261_p3), %s1033_s24, %s1037_s25 }
   0x9   : > { %s1299_s30 = smov (%p31_p4, %s1297_s30), 0  ;;  %264 = sbr.rel (%p261_p3) target bundleno = 610 (0x262), region = 48 }
   0xa   : > { %s296_s10 = smul.u32 (!%p261_p3), %s1033_s24, %s295_s8  ;;  %s1131_s11 = sshll.u32 (!%p261_p3), %s1033_s24, 6 }
   0xb   : > { %s862_s12 = sshll.u32 (!%p261_p3), %s305_s9, 3  ;;  %p865_p7 = scmp.ne.s32.totalorder (!%p261_p3), %s1037_s25, 0 }
   0xc   : > { %s860_s13 = sshll.u32 (!%p261_p3), %s296_s10, 3  ;;  %p307_p5 = scmp.lt.s32.totalorder (!%p261_p3), %s862_s12, 31 }
   0xd   : > { %p298_p6 = scmp.lt.s32.totalorder (!%p261_p3), %s860_s13, 31 }
  0x10   : > { %s1301_s12 = smov (!%p307_p5, %s862_s12), 31  ;;  %s1303_s13 = smov (!%p298_p6, %s860_s13), 31 }
  0x11   : > { %s863_s14 = sshll.u32 %s1301_s12, 3  ;;  %s861_s15 = sshll.u32 %s1303_s13, 3 }
  0x12   : > { %s1136_s18 = scalar_lea.vmem %s1289_s7, %s863_s14  ;;  %s301_s21 = scalar_lea.vmem %s1282_s0, %s861_s15 }
  0x13   : > { %318 = sbr.rel (%p865_p7) target bundleno = 321 (0x141), region = 52  ;;  %p866_p8 = scmp.ne.s32.totalorder (!%p865_p7), %s1033_s24, 0 }
  0x1a   : > { %322 = sbr.rel (%p866_p8) target bundleno = 33 (0x21), region = 56  ;;  %v1051_v0 = vmov (!%p866_p8), 0.0  }
  0x1b   : > { %323 = vst [vmem:[#allocation3] sm:$0x1] (!%p866_p8), %v1051_v0  ;;  %324 = vst [vmem:[#allocation4] sm:$0x1] (!%p866_p8), %v1051_v0 }
  0x21 PF: > { %v1000_v1 = vld [vmem:[%s1283_s1] sm:$0xff]   ;;  %v326_v3 = vld [vmem:[%s301_s21 + $0x8] sm:$0xff]  ;;  %vm352_vm0 = vcmask 130048   ;;  %v327_v7 = vld [vmem:[%s301_s21 + $0x10] sm:$0xff]  ;;  %s438_s10 = scalar_lea.vmem [#allocation2], %s1131_s11  ;;  %p873_p9 = scmp.ne.s32.totalorder %s1033_s24, 3 }
  0x22   : > { %v325_v2 = vld [vmem:[%s301_s21] sm:$0xff]  ;;  %907 = vmatprep.subr.bf16.mxu0 %v1000_v1  ;;  %941 = vmatprep.subr.bf16.mxu1 %v1000_v1  ;;  %v330_v6 = vld [vmem:[%s301_s21 + $0x28] sm:$0xff]  ;;  %v328_v8 = vld [vmem:[%s301_s21 + $0x18] sm:$0xff]  ;;  %v451_v39 = vlaneseq (!%p873_p9)  ;;  %v460_v41 = vstv (!%p873_p9), %s1131_s11 }
  0x23   : > { %v329_v4 = vld [vmem:[%s301_s21 + $0x20] sm:$0xff]  ;;  %v333_v5 = vpack.c.bf16 %v326_v3, %v325_v2  ;;  %908 = vmatpush3.bf16.msra.mxu0 %v1000_v1  ;;  %942 = vmatpush3.bf16.msra.mxu1 %v1000_v1  ;;  %v334_v10 = vpack.c.bf16 %v328_v8, %v327_v7  ;;  %v331_v11 = vld [vmem:[%s301_s21 + $0x30] sm:$0xff]  ;;  %v332_v12 = vld [vmem:[%s301_s21 + $0x38] sm:$0xff] }
  0x24   : > { %v335_v9 = vpack.c.bf16 %v330_v6, %v329_v4  ;;  %v336_v13 = vpack.c.bf16 %v332_v12, %v331_v11  ;;  %v867_v14 = vld [vmem:[%s1284_s2] ss:$0 sm:$0xff]  ;;  %v452_v40 = vshrl.u32 (!%p873_p9), %v451_v39, 7 }
  0x25   : > { %909 = vmatprep.mubr.msk.bf16.mxu0 %vm352_vm0, %v333_v5  ;;  %v485_v39 = vld [vmem:[#allocation3] sm:$0x1] (!%p873_p9) }
  0x26   : > { %913 = vmatprep.mubr.msk.bf16.mxu1 %vm352_vm0, %v335_v9  ;;  %910 = vmatmul.mubr.msk.bf16.vlgmr.msra.gmra.mrb[0].mxu0 %vm352_vm0, %v334_v10  ;;  %v453_v42 = vadd.s32 (!%p873_p9), 8, %v452_v40  ;;  %v454_v43 = vadd.s32 (!%p873_p9), 16, %v452_v40  ;;  %v455_v44 = vadd.s32 (!%p873_p9), 24, %v452_v40  ;;  %v456_v45 = vadd.s32 (!%p873_p9), 32, %v452_v40 }
  0x27   : > { %914 = vmatmul.mubr.msk.bf16.vlgmr.msra.gmra.mrb[0].mxu1 %vm352_vm0, %v336_v13  ;;  %v457_v46 = vadd.s32 (!%p873_p9), 40, %v452_v40  ;;  %v458_v47 = vadd.s32 (!%p873_p9), 48, %v452_v40  ;;  %v461_v48 = vadd.s32 (!%p873_p9), %v460_v41, %v452_v40  ;;  %v459_v53 = vadd.s32 (!%p873_p9), 56, %v452_v40 }
  0x28   : > { %v462_v49 = vadd.s32 (!%p873_p9), %v460_v41, %v453_v42  ;;  %v463_v50 = vadd.s32 (!%p873_p9), %v460_v41, %v454_v43  ;;  %v464_v51 = vadd.s32 (!%p873_p9), %v460_v41, %v455_v44  ;;  %v465_v52 = vadd.s32 (!%p873_p9), %v460_v41, %v456_v45  ;;  %v501_v44 = vld [vmem:[#allocation4] sm:$0x1] (!%p873_p9) }
  0x29   : > { %vm469_vm1 = vcmp.lt.s32.totalorder (!%p873_p9), %v461_v48, 200  ;;  %v466_v54 = vadd.s32 (!%p873_p9), %v460_v41, %v457_v46  ;;  %v467_v56 = vadd.s32 (!%p873_p9), %v460_v41, %v458_v47  ;;  %v468_v59 = vadd.s32 (!%p873_p9), %v460_v41, %v459_v53 }
  0x2a   : > { %vm470_vm2 = vcmp.lt.s32.totalorder (!%p873_p9), %v462_v49, 200  ;;  %vm471_vm3 = vcmp.lt.s32.totalorder (!%p873_p9), %v463_v50, 200  ;;  %vm472_vm4 = vcmp.lt.s32.totalorder (!%p873_p9), %v464_v51, 200  ;;  %vm473_vm5 = vcmp.lt.s32.totalorder (!%p873_p9), %v465_v52, 200 }
  0x2b   : > { %vm474_vm6 = vcmp.lt.s32.totalorder (!%p873_p9), %v466_v54, 200  ;;  %vm475_vm7 = vcmp.lt.s32.totalorder (!%p873_p9), %v467_v56, 200  ;;  %vm476_vm8 = vcmp.lt.s32.totalorder (!%p873_p9), %v468_v59, 200 }
  0xf9   : > { %v911_v15 = vpop.f32.mrb[0].mxu0 }
  0xfa   : > { %v915_v16 = vpop.f32.mrb[0].mxu1  ;;  %v408_v17 = vadd.f32 %v911_v15, %v867_v14  ;;  %v399_v19 = vpop.f32.mrb[1].mxu0 }
  0xfb   : > { %v424_v18 = vadd.f32 %v915_v16, %v867_v14  ;;  %v415_v20 = vpop.f32.mrb[1].mxu1  ;;  %v400_v21 = vadd.f32 %v867_v14, %v399_v19  ;;  %v912_v23 = vpop.f32.mrb[2].mxu0 }
  0xfc   : > { %v416_v22 = vadd.f32 %v867_v14, %v415_v20  ;;  %v916_v24 = vpop.f32.mrb[2].mxu1  ;;  %v1153_v25 = vmax.f32 %v408_v17, 0.0  ;;  %v411_v27 = vadd.f32 %v912_v23, %v867_v14  ;;  %v402_v29 = vpop.f32.mrb[3].mxu0  ;;  %450 = sbr.rel (%p873_p9) target bundleno = 289 (0x121), region = 60 }
  0xfd   : > { %v1155_v26 = vmax.f32 %v424_v18, 0.0  ;;  %v427_v28 = vadd.f32 %v916_v24, %v867_v14  ;;  %v418_v30 = vpop.f32.mrb[3].mxu1  ;;  %v1157_v31 = vmax.f32 %v400_v21, 0.0  ;;  %v403_v33 = vadd.f32 %v867_v14, %v402_v29 }
  0xfe   : > { %v1159_v32 = vmax.f32 %v416_v22, 0.0  ;;  %v419_v34 = vadd.f32 %v867_v14, %v418_v30  ;;  %441 = vst [vmem:[%s438_s10 + $0x10] sm:$0xff] %v1153_v25  ;;  %v1164_v35 = vmax.f32 %v411_v27, 0.0  ;;  %v479_v58 = vsel (!%p873_p9), %vm471_vm3, %v1153_v25, 0.0 }
  0xff   : > { %445 = vst [vmem:[%s438_s10 + $0x30] sm:$0xff] %v1155_v26  ;;  %v1166_v36 = vmax.f32 %v427_v28, 0.0  ;;  %439 = vst [vmem:[%s438_s10] sm:$0xff] %v1157_v31  ;;  %v1170_v37 = vmax.f32 %v403_v33, 0.0  ;;  %v477_v55 = vsel (!%p873_p9), %vm469_vm1, %v1157_v31, 0.0  ;;  %v504_v0 = vmul.f32 (!%p873_p9), %v479_v58, %v479_v58 }
 0x100   : > { %443 = vst [vmem:[%s438_s10 + $0x20] sm:$0xff] %v1159_v32  ;;  %v1172_v38 = vmax.f32 %v419_v34, 0.0  ;;  %442 = vst [vmem:[%s438_s10 + $0x18] sm:$0xff] %v1164_v35  ;;  %v480_v60 = vsel (!%p873_p9), %vm472_vm4, %v1164_v35, 0.0  ;;  %v502_v62 = vmul.f32 (!%p873_p9), %v477_v55, %v477_v55  ;;  %v481_v1 = vsel (!%p873_p9), %vm473_vm5, %v1159_v32, 0.0 }
 0x101   : > { %446 = vst [vmem:[%s438_s10 + $0x38] sm:$0xff] %v1166_v36  ;;  %440 = vst [vmem:[%s438_s10 + $0x8] sm:$0xff] %v1170_v37  ;;  %v478_v57 = vsel (!%p873_p9), %vm470_vm2, %v1170_v37, 0.0  ;;  %v505_v3 = vmul.f32 (!%p873_p9), %v480_v60, %v480_v60  ;;  %v506_v7 = vmul.f32 (!%p873_p9), %v481_v1, %v481_v1  ;;  %v483_v9 = vsel (!%p873_p9), %vm475_vm7, %v1155_v26, 0.0 }
 0x102   : > { %444 = vst [vmem:[%s438_s10 + $0x28] sm:$0xff] %v1172_v38  ;;  %v486_v61 = vadd.f32 (!%p873_p9), %v478_v57, %v477_v55  ;;  %v503_v63 = vmul.f32 (!%p873_p9), %v478_v57, %v478_v57  ;;  %v482_v5 = vsel (!%p873_p9), %vm474_vm6, %v1172_v38, 0.0  ;;  %v484_v13 = vsel (!%p873_p9), %vm476_vm8, %v1166_v36, 0.0 }
 0x103   : > { %v507_v11 = vmul.f32 %v482_v5, %v482_v5  ;;  %v508_v15 = vmul.f32 %v483_v9, %v483_v9  ;;  %v509_v18 = vmul.f32 %v484_v13, %v484_v13 }
 0x104   : > { %v487_v2 = vadd.f32 %v486_v61, %v479_v58  ;;  %v510_v4 = vadd.f32 %v503_v63, %v502_v62 }
 0x106   : > { %v488_v6 = vadd.f32 %v487_v2, %v480_v60  ;;  %v511_v8 = vadd.f32 %v510_v4, %v504_v0 }
 0x108   : > { %v489_v10 = vadd.f32 %v488_v6, %v481_v1  ;;  %v512_v12 = vadd.f32 %v511_v8, %v505_v3 }
 0x10a   : > { %v490_v14 = vadd.f32 %v489_v10, %v482_v5  ;;  %v513_v16 = vadd.f32 %v512_v12, %v506_v7 }
 0x10c   : > { %v491_v17 = vadd.f32 %v490_v14, %v483_v9  ;;  %v514_v19 = vadd.f32 %v513_v16, %v507_v11 }
 0x10e   : > { %v492_v20 = vadd.f32 %v491_v17, %v484_v13  ;;  %v515_v21 = vadd.f32 %v514_v19, %v508_v15 }
 0x110   : > { %v493_v22 = vrot.slane %v492_v20, 4  ;;  %v516_v23 = vadd.f32 %v515_v21, %v509_v18 }
 0x112   : > { %v494_v24 = vadd.f32 %v493_v22, %v492_v20  ;;  %v517_v27 = vrot.slane %v516_v23, 4 }
 0x114   : > { %v495_v28 = vrot.slane %v494_v24, 2  ;;  %v518_v29 = vadd.f32 %v517_v27, %v516_v23 }
 0x116   : > { %v496_v30 = vadd.f32 %v495_v28, %v494_v24  ;;  %v519_v33 = vrot.slane %v518_v29, 2 }
 0x118   : > { %v497_v34 = vrot.slane %v496_v30, 1  ;;  %v520_v40 = vadd.f32 %v519_v33, %v518_v29 }
 0x11a   : > { %v498_v41 = vadd.f32 %v497_v34, %v496_v30  ;;  %v521_v42 = vrot.slane %v520_v40, 1 }
 0x11c   : > { %v499_v43 = vadd.f32 %v498_v41, %v485_v39  ;;  %v522_v45 = vadd.f32 %v521_v42, %v520_v40 }
 0x11e   : > { %500 = vst [vmem:[#allocation3] sm:$0x1] %v499_v43  ;;  %v523_v46 = vadd.f32 %v522_v45, %v501_v44 }
 0x120   : > { %524 = vst [vmem:[#allocation4] sm:$0x1] %v523_v46 }
 0x121 PF: > { %p874_p10 = scmp.eq.s32.totalorder %s1033_s24, 3 }
 0x122   : > { %v530_v47 = vadd.f32 (!%p874_p10), %v1170_v37, %v1157_v31  ;;  %v546_v48 = vmul.f32 (!%p874_p10), %v1157_v31, %v1157_v31  ;;  %v547_v49 = vmul.f32 (!%p874_p10), %v1170_v37, %v1170_v37  ;;  %v548_v50 = vmul.f32 (!%p874_p10), %v1153_v25, %v1153_v25 }
 0x123   : > { %528 = sbr.rel (%p874_p10) target bundleno = 321 (0x141), region = 64  ;;  %v549_v52 = vmul.f32 (!%p874_p10), %v1164_v35, %v1164_v35  ;;  %v550_v55 = vmul.f32 (!%p874_p10), %v1159_v32, %v1159_v32  ;;  %v551_v37 = vmul.f32 (!%p874_p10), %v1172_v38, %v1172_v38 }
 0x124   : > { %v531_v51 = vadd.f32 (!%p874_p10), %v530_v47, %v1153_v25  ;;  %v554_v53 = vadd.f32 (!%p874_p10), %v547_v49, %v546_v48  ;;  %v552_v25 = vmul.f32 (!%p874_p10), %v1155_v26, %v1155_v26 }
 0x125   : > { %v529_v8 = vld [vmem:[#allocation3] sm:$0x1] (!%p874_p10) }
 0x126   : > { %v532_v54 = vadd.f32 (!%p874_p10), %v531_v51, %v1164_v35  ;;  %v555_v56 = vadd.f32 (!%p874_p10), %v554_v53, %v548_v50  ;;  %v553_v35 = vmul.f32 (!%p874_p10), %v1166_v36, %v1166_v36 }
 0x127   : > { %v545_v10 = vld [vmem:[#allocation4] sm:$0x1] (!%p874_p10) }
 0x128   : > { %v533_v31 = vadd.f32 (!%p874_p10), %v532_v54, %v1159_v32  ;;  %v556_v57 = vadd.f32 (!%p874_p10), %v555_v56, %v549_v52 }
 0x12a   : > { %v534_v58 = vadd.f32 %v533_v31, %v1172_v38  ;;  %v557_v59 = vadd.f32 %v556_v57, %v550_v55 }
 0x12c   : > { %v535_v60 = vadd.f32 %v534_v58, %v1155_v26  ;;  %v558_v61 = vadd.f32 %v557_v59, %v551_v37 }
 0x12e   : > { %v536_v62 = vadd.f32 %v535_v60, %v1166_v36  ;;  %v559_v63 = vadd.f32 %v558_v61, %v552_v25 }
 0x130   : > { %v537_v32 = vrot.slane %v536_v62, 4  ;;  %v560_v0 = vadd.f32 %v559_v63, %v553_v35 }
 0x132   : > { %v538_v1 = vadd.f32 %v537_v32, %v536_v62  ;;  %v561_v2 = vrot.slane %v560_v0, 4 }
 0x134   : > { %v539_v3 = vrot.slane %v538_v1, 2  ;;  %v562_v4 = vadd.f32 %v561_v2, %v560_v0 }
 0x136   : > { %v540_v38 = vadd.f32 %v539_v3, %v538_v1  ;;  %v563_v5 = vrot.slane %v562_v4, 2 }
 0x138   : > { %v541_v6 = vrot.slane %v540_v38, 1  ;;  %v564_v7 = vadd.f32 %v563_v5, %v562_v4 }
 0x13a   : > { %v542_v9 = vadd.f32 %v541_v6, %v540_v38  ;;  %v565_v26 = vrot.slane %v564_v7, 1 }
 0x13c   : > { %v543_v11 = vadd.f32 %v542_v9, %v529_v8  ;;  %v566_v12 = vadd.f32 %v565_v26, %v564_v7 }
 0x13e   : > { %544 = vst [vmem:[#allocation3] sm:$0x1] %v543_v11  ;;  %v567_v13 = vadd.f32 %v566_v12, %v545_v10 }
 0x140   : > { %568 = vst [vmem:[#allocation4] sm:$0x1] %v567_v13 }
 0x141 PF: > { %p875_p11 = scmp.ne.s32.totalorder %s1037_s25, 1 }
 0x142   : > { %p876_p12 = scmp.ne.s32.totalorder (!%p875_p11), %s1033_s24, 0 }
 0x143   : > { %572 = sbr.rel (%p875_p11) target bundleno = 610 (0x262), region = 68 }
 0x14a   : > { %576 = sbr.rel (%p876_p12) target bundleno = 359 (0x167), region = 72  ;;  %v577_v36 = vld [vmem:[#allocation3] sm:$0x1] (!%p876_p12)  ;;  %v579_v14 = vld [vmem:[#allocation4] sm:$0x1] (!%p876_p12) }
 0x14b   : > { %v578_v15 = vmul.f32 (!%p876_p12), 0.005, %v577_v36  ;;  %v580_v16 = vmul.f32 (!%p876_p12), 0.005, %v579_v14  ;;  %v586_v21 = vld [vmem:[%s1285_s3] sm:$0x1] (!%p876_p12) }
 0x14c   : > { %v589_v24 = vld [vmem:[%s1286_s4] sm:$0x1] (!%p876_p12) }
 0x14d   : > { %v581_v17 = vmul.f32 (!%p876_p12), %v578_v15, %v578_v15 }
 0x14f   : > { %v582_v18 = vsub.f32 (!%p876_p12), %v580_v16, %v581_v17 }
 0x151   : > { %v583_v19 = vmax.f32 %v582_v18, 0.0 }
 0x153   : > { %v584_v20 = vadd.f32 1e-05, %v583_v19 }
 0x155   : > { %1001 = vrsqrt.f32 %v584_v20 }
 0x15f   : > { %v1002_v22 = vpop.eup %1001 }
 0x160   : > { %v587_v23 = vmul.f32 %v1002_v22, %v586_v21 }
 0x162   : > { %588 = vst [vmem:[#allocation5] sm:$0x1] %v587_v23  ;;  %v590_v27 = vmul.f32 %v587_v23, %v578_v15 }
 0x164   : > { %v591_v28 = vsub.f32 %v589_v24, %v590_v27 }
 0x166   : > { %592 = vst [vmem:[#allocation6] sm:$0x1] %v591_v28 }
 0x167 PF: > { %v1003_v29 = vld [vmem:[%s1287_s5] sm:$0xff]   ;;  %v1004_v30 = vld [vmem:[%s1287_s5 + $0x8] sm:$0xff]   ;;  %v1005_v33 = vld [vmem:[%s1287_s5 + $0x10] sm:$0xff]   ;;  %s1234_s23 = scalar_lea.vmem [#allocation2], %s1131_s11 }
 0x168   : > { %917 = vmatprep.subr.bf16.mxu0 %v1003_v29  ;;  %943 = vmatprep.subr.bf16.mxu1 %v1003_v29  ;;  %v1006_v34 = vld [vmem:[%s1287_s5 + $0x18] sm:$0xff]   ;;  %v594_v39 = vld [vmem:[%s1234_s23] sm:$0xff]  ;;  %v595_v40 = vld [vmem:[%s1234_s23 + $0x8] sm:$0xff] }
 0x169   : > { %918 = vmatpush3.bf16.msra.mxu0 %v1003_v29  ;;  %951 = vmatpush3.bf16.msra.mxu1 %v1003_v29  ;;  %v877_v41 = vld [vmem:[#allocation5] ss:$0 sm:$0xff]  ;;  %v599_v46 = vld [vmem:[%s1234_s23 + $0x28] sm:$0xff]  ;;  %v596_v31 = vld [vmem:[%s1234_s23 + $0x10] sm:$0xff] }
 0x16a   : > { %919 = vmatprep.subr.bf16.mxu0 %v1004_v30  ;;  %944 = vmatprep.subr.bf16.mxu1 %v1004_v30  ;;  %v609_v42 = vmul.f32 %v877_v41, %v594_v39  ;;  %v610_v43 = vmul.f32 %v877_v41, %v595_v40  ;;  %v598_v45 = vld [vmem:[%s1234_s23 + $0x20] sm:$0xff]  ;;  %v614_v48 = vmul.f32 %v877_v41, %v599_v46  ;;  %v1008_v56 = vld [vmem:[%s1287_s5 + $0x28] sm:$0xff]   ;;  %v597_v37 = vld [vmem:[%s1234_s23 + $0x18] sm:$0xff] }
 0x16b   : > { %v613_v47 = vmul.f32 %v877_v41, %v598_v45  ;;  %v1007_v51 = vld [vmem:[%s1287_s5 + $0x20] sm:$0xff]   ;;  %v600_v57 = vld [vmem:[%s1234_s23 + $0x30] sm:$0xff]  ;;  %v601_v58 = vld [vmem:[%s1234_s23 + $0x38] sm:$0xff]  ;;  %v611_v59 = vmul.f32 %v877_v41, %v596_v31  ;;  %v612_v60 = vmul.f32 %v877_v41, %v597_v37 }
 0x16c   : > { %v1009_v25 = vld [vmem:[%s1287_s5 + $0x30] sm:$0xff]   ;;  %v615_v35 = vmul.f32 %v877_v41, %v600_v57  ;;  %v616_v61 = vmul.f32 %v877_v41, %v601_v58  ;;  %v1010_v62 = vld [vmem:[%s1287_s5 + $0x38] sm:$0xff]   ;;  %v879_v4 = vld [vmem:[%s1288_s6] ss:$0 sm:$0xff] }
 0x16d   : > { %920 = vmatpush3.bf16.msra.mxu0 %v1004_v30  ;;  %952 = vmatpush3.bf16.msra.mxu1 %v1004_v30  ;;  %v878_v44 = vld [vmem:[#allocation6] ss:$0 sm:$0xff] }
 0x16e   : > { %921 = vmatprep.subr.bf16.mxu0 %v1005_v33  ;;  %945 = vmatprep.subr.bf16.mxu1 %v1005_v33  ;;  %v624_v49 = vadd.f32 %v878_v44, %v609_v42  ;;  %v625_v50 = vadd.f32 %v878_v44, %v610_v43  ;;  %v628_v52 = vadd.f32 %v878_v44, %v613_v47 }
 0x16f   : > { %v629_v53 = vadd.f32 %v878_v44, %v614_v48  ;;  %v626_v63 = vadd.f32 %v878_v44, %v611_v59  ;;  %v627_v32 = vadd.f32 %v878_v44, %v612_v60  ;;  %v630_v0 = vadd.f32 %v878_v44, %v615_v35 }
 0x170   : > { %v632_v54 = vpack.c.bf16 %v625_v50, %v624_v49  ;;  %v631_v1 = vadd.f32 %v878_v44, %v616_v61 }
 0x171   : > { %922 = vmatpush3.bf16.msra.mxu0 %v1005_v33  ;;  %953 = vmatpush3.bf16.msra.mxu1 %v1005_v33  ;;  %v634_v55 = vpack.c.bf16 %v629_v53, %v628_v52  ;;  %v633_v2 = vpack.c.bf16 %v627_v32, %v626_v63 }
 0x172   : > { %923 = vmatprep.subr.bf16.mxu0 %v1006_v34  ;;  %946 = vmatprep.subr.bf16.mxu1 %v1006_v34  ;;  %v635_v3 = vpack.c.bf16 %v631_v1, %v630_v0 }
 0x173   : > { %933 = vmatprep.mubr.bf16.mxu0 %v632_v54  ;;  %937 = vmatprep.mubr.bf16.mxu1 %v634_v55 }
 0x175   : > { %924 = vmatpush3.bf16.msra.mxu0 %v1006_v34  ;;  %954 = vmatpush3.bf16.msra.mxu1 %v1006_v34 }
 0x176   : > { %925 = vmatprep.subr.bf16.mxu0 %v1007_v51  ;;  %947 = vmatprep.subr.bf16.mxu1 %v1007_v51 }
 0x179   : > { %926 = vmatpush3.bf16.msra.mxu0 %v1007_v51  ;;  %955 = vmatpush3.bf16.msra.mxu1 %v1007_v51 }
 0x17a   : > { %927 = vmatprep.subr.bf16.mxu0 %v1008_v56  ;;  %948 = vmatprep.subr.bf16.mxu1 %v1008_v56 }
 0x17d   : > { %928 = vmatpush3.bf16.msra.mxu0 %v1008_v56  ;;  %956 = vmatpush3.bf16.msra.mxu1 %v1008_v56 }
 0x17e   : > { %929 = vmatprep.subr.bf16.mxu0 %v1009_v25  ;;  %949 = vmatprep.subr.bf16.mxu1 %v1009_v25 }
 0x181   : > { %930 = vmatpush3.bf16.msra.mxu0 %v1009_v25  ;;  %957 = vmatpush3.bf16.msra.mxu1 %v1009_v25 }
 0x182   : > { %931 = vmatprep.subr.bf16.mxu0 %v1010_v62  ;;  %950 = vmatprep.subr.bf16.mxu1 %v1010_v62 }
 0x185   : > { %932 = vmatpush3.bf16.msra.mxu0 %v1010_v62  ;;  %958 = vmatpush3.bf16.msra.mxu1 %v1010_v62 }
 0x188   : > { %934 = vmatmul.mubr.bf16.vlgmr.msra.gmra.mrb[0].mxu0 %v633_v2  ;;  %938 = vmatmul.mubr.bf16.vlgmr.msra.gmra.mrb[0].mxu1 %v635_v3 }
 0x25b   : > { %v935_v38 = vpop.f32.mrb[0].mxu0  ;;  %v939_v5 = vpop.f32.mrb[0].mxu1 }
 0x25c   : > { %v750_v6 = vadd.f32 %v935_v38, %v879_v4  ;;  %v766_v7 = vadd.f32 %v939_v5, %v879_v4  ;;  %v741_v8 = vpop.f32.mrb[1].mxu0  ;;  %v757_v9 = vpop.f32.mrb[1].mxu1 }
 0x25d   : > { %v742_v26 = vadd.f32 %v879_v4, %v741_v8  ;;  %v758_v10 = vadd.f32 %v879_v4, %v757_v9  ;;  %v936_v11 = vpop.f32.mrb[2].mxu0  ;;  %v940_v12 = vpop.f32.mrb[2].mxu1 }
 0x25e   : > { %774 = vst [vmem:[%s1136_s18 + $0x10] sm:$0xff] %v750_v6  ;;  %778 = vst [vmem:[%s1136_s18 + $0x30] sm:$0xff] %v766_v7  ;;  %v753_v13 = vadd.f32 %v936_v11, %v879_v4  ;;  %v769_v36 = vadd.f32 %v940_v12, %v879_v4  ;;  %v744_v14 = vpop.f32.mrb[3].mxu0  ;;  %v760_v15 = vpop.f32.mrb[3].mxu1 }
 0x25f   : > { %772 = vst [vmem:[%s1136_s18] sm:$0xff] %v742_v26  ;;  %776 = vst [vmem:[%s1136_s18 + $0x20] sm:$0xff] %v758_v10  ;;  %v745_v16 = vadd.f32 %v879_v4, %v744_v14  ;;  %v761_v17 = vadd.f32 %v879_v4, %v760_v15 }
 0x260   : > { %775 = vst [vmem:[%s1136_s18 + $0x18] sm:$0xff] %v753_v13  ;;  %779 = vst [vmem:[%s1136_s18 + $0x38] sm:$0xff] %v769_v36 }
 0x261   : > { %773 = vst [vmem:[%s1136_s18 + $0x8] sm:$0xff] %v745_v16  ;;  %777 = vst [vmem:[%s1136_s18 + $0x28] sm:$0xff] %v761_v17 }
 0x262 PF: > { %s17_s28 = sadd.s32 1, %s1049_s28   ;;  %s1290_s24 = smov %s1041_s26 }
 0x263   : > { %p14_p13 = scmp.ge.s32.totalorder %s17_s28, 10   ;;  %s1291_s25 = smov %s1045_s27 }
 0x264   : > { %s1292_s26 = smov %s1295_s29  ;;  %s1293_s27 = smov %s1299_s30 }
 0x265   :  { %16 = sbr.rel (!%p14_p13) target bundleno = 3 (0x3), region = 104 }

</bundles_post_ra>
